<compile_context>
chip_gen: v7x
topology: tpu7x:2x2x1
jax: 0.10.0
libtpu: 0.0.40
codegen_flags: <defaults>
</compile_context>

<pallas_src>
import math
from functools import partial

import jax
import jax.numpy as jnp
from jax.experimental import pallas as pl
from jax.experimental.pallas import tpu as pltpu

D_MODEL = 32
NHEAD = 4
DIM_FF = 64
LN_EPS = 1e-5

# Flip to jnp.bfloat16 on v6e/v7x for 2x MXU throughput (accumulation stays
# f32). Kept float32 by default to match the PyTorch float32 forward exactly.
MATMUL_DTYPE = jnp.float32


def _mm(a, b):
    return jnp.dot(a.astype(MATMUL_DTYPE), b.astype(MATMUL_DTYPE),
                   preferred_element_type=jnp.float32)


def _layernorm(z, gamma, beta):
    mu = jnp.mean(z, axis=-1, keepdims=True)
    var = jnp.mean(jnp.square(z - mu), axis=-1, keepdims=True)
    return (z - mu) * jax.lax.rsqrt(var + LN_EPS) * gamma + beta


# ---------------- fused encoder-layer kernel ----------------

def _encoder_layer_kernel(src_ref, pos_ref, bias_ref,
                          wqk_ref, bqk_ref, wv_ref, bv_ref, wo_ref, bo_ref,
                          g1_ref, be1_ref, w1_ref, b1_ref, w2_ref, b2_ref,
                          g2_ref, be2_ref, o_ref, *, nhead, scale):
    # One grid program == one batch element; everything stays in VMEM/vregs.
    x = src_ref[0].astype(jnp.float32)          # (S, D)
    qin = x + pos_ref[0].astype(jnp.float32)    # q = k = src + pos
    bias = bias_ref[0]                          # (1, S) additive key-padding bias

    d = x.shape[-1]
    dh = d // nhead

    # Fused Q|K projection (one MXU push) and V projection.
    qk = _mm(qin, wqk_ref[...]) + bqk_ref[...]  # (S, 2D)
    v = _mm(x, wv_ref[...]) + bv_ref[...]       # (S, D)

    heads = []
    for h in range(nhead):                      # static unroll over heads
        qh = qk[:, h * dh:(h + 1) * dh]
        kh = qk[:, d + h * dh:d + (h + 1) * dh]
        vh = v[:, h * dh:(h + 1) * dh]
        s = jnp.einsum('qd,kd->qk', qh, kh,
                       preferred_element_type=jnp.float32) * scale + bias
        s = s - jnp.max(s, axis=-1, keepdims=True)
        p = jnp.exp(s)
        p = p * pl.reciprocal(jnp.sum(p, axis=-1, keepdims=True), approx=True)
        heads.append(_mm(p, vh))
    attn = jnp.concatenate(heads, axis=-1)      # (S, D), heads packed lane-dense

    attn = _mm(attn, wo_ref[...]) + bo_ref[...]

    # residual + LayerNorm1
    y = _layernorm(x + attn, g1_ref[...], be1_ref[...])

    # FFN (relu); dropout = identity at inference
    hdn = jnp.maximum(_mm(y, w1_ref[...]) + b1_ref[...], 0.0)
    f = _mm(hdn, w2_ref[...]) + b2_ref[...]

    # residual + LayerNorm2
    out = _layernorm(y + f, g2_ref[...], be2_ref[...])
    o_ref[0] = out.astype(o_ref.dtype)


# ---------------- wrapper ----------------

def transformer_encoder_layer(params, src, pos=None, src_key_padding_mask=None,
                              nhead=NHEAD):
    """Fused TransformerEncoderLayer.forward_post.  src/pos: (S, B, D)."""
    # TODO(synk): src_mask (attn_mask) and the enc_pos_concat1x1 / gelu / glu
    # branches are not exercised by the default config and are not implemented.
    s_len, bsz, d = src.shape
    if pos is None:
        pos = jnp.zeros_like(src)
    x_bsd = jnp.transpose(src, (1, 0, 2))       # single layout transpose in, one out
    p_bsd = jnp.transpose(pos, (1, 0, 2))
    if src_key_padding_mask is None:
        bias = jnp.zeros((bsz, 1, s_len), jnp.float32)
    else:
        bias = jnp.where(src_key_padding_mask, -1e9, 0.0
                         ).astype(jnp.float32)[:, None, :]

    dh = d // nhead
    scale = 1.0 / math.sqrt(dh)
    dff = params['w1'].shape[1]

    full = lambda shape: pl.BlockSpec(shape, lambda b: (0, 0))     # weights (shared)
    perb = lambda shape: pl.BlockSpec(shape, lambda b: (b, 0, 0))  # per-batch slabs

    in_specs = [
        perb((1, s_len, d)),                 # src
        perb((1, s_len, d)),                 # pos
        perb((1, 1, s_len)),                 # key-padding bias
        full((d, 2 * d)), full((1, 2 * d)),  # wqk, bqk
        full((d, d)), full((1, d)),          # wv, bv
        full((d, d)), full((1, d)),          # wo, bo
        full((1, d)), full((1, d)),          # norm1 gamma/beta
        full((d, dff)), full((1, dff)),      # w1, b1
        full((dff, d)), full((1, d)),        # w2, b2
        full((1, d)), full((1, d)),          # norm2 gamma/beta
    ]

    out = pl.pallas_call(
        partial(_encoder_layer_kernel, nhead=nhead, scale=scale),
        out_shape=jax.ShapeDtypeStruct((bsz, s_len, d), src.dtype),
        grid_spec=pltpu.PrefetchScalarGridSpec(
            num_scalar_prefetch=0,
            grid=(bsz,),
            in_specs=in_specs,
            out_specs=perb((1, s_len, d)),
        ),
        compiler_params=pltpu.CompilerParams(
            dimension_semantics=("parallel",)),
    )(x_bsd, p_bsd, bias,
      params['wqk'], params['bqk'], params['wv'], params['bv'],
      params['wo'], params['bo'],
      params['norm1_g'], params['norm1_b'],
      params['w1'], params['b1'], params['w2'], params['b2'],
      params['norm2_g'], params['norm2_b'])
    return jnp.transpose(out, (1, 0, 2))        # back to (S, B, D)


# ---------------- deterministic parameter init ----------------

def xavier_uniform(key, din, dout):
    limit = math.sqrt(6.0 / (din + dout))
    return jax.random.uniform(key, (din, dout), jnp.float32, -limit, limit)


def init_encoder_layer_params(key, d=D_MODEL, dff=DIM_FF):
    kq, kk, kv, ko, k1, k2 = jax.random.split(key, 6)
    wq = xavier_uniform(kq, d, d)
    wk = xavier_uniform(kk, d, d)
    return dict(
        wqk=jnp.concatenate([wq, wk], axis=1),        # fused Q|K projection
        bqk=jnp.zeros((1, 2 * d), jnp.float32),
        wv=xavier_uniform(kv, d, d), bv=jnp.zeros((1, d), jnp.float32),
        wo=xavier_uniform(ko, d, d), bo=jnp.zeros((1, d), jnp.float32),
        w1=xavier_uniform(k1, d, dff), b1=jnp.zeros((1, dff), jnp.float32),
        w2=xavier_uniform(k2, dff, d), b2=jnp.zeros((1, d), jnp.float32),
        norm1_g=jnp.ones((1, d), jnp.float32),
        norm1_b=jnp.zeros((1, d), jnp.float32),
        norm2_g=jnp.ones((1, d), jnp.float32),
        norm2_b=jnp.zeros((1, d), jnp.float32),
    )


if __name__ == "__main__":
    key = jax.random.PRNGKey(0)
    k_param, k_src, k_pos = jax.random.split(key, 3)
    s_len, bsz, d = 16, 2, D_MODEL   # e.g. a 4x4 feature map flattened, batch 2

    params = init_encoder_layer_params(k_param)
    src = jax.random.normal(k_src, (s_len, bsz, d), jnp.float32)
    pos = jax.random.normal(k_pos, (s_len, bsz, d), jnp.float32)
    key_padding_mask = jnp.zeros((bsz, s_len), jnp.bool_).at[:, -1].set(True)

    fwd = jax.jit(partial(transformer_encoder_layer, nhead=NHEAD))
    out = fwd(params, src, pos, key_padding_mask)
    jax.block_until_ready(out)
    assert out.shape == (s_len, bsz, d), out.shape
    print("KERNEL_OK")
</pallas_src>

<mosaic_0001>
module attributes {stable_mosaic.version = 11 : i64} {
  func.func @_encoder_layer_kernel(%arg0: i32, %arg1: memref<1x16x32xf32, #tpu.memory_space<vmem>>, %arg2: memref<1x16x32xf32, #tpu.memory_space<vmem>>, %arg3: memref<1x1x16xf32, #tpu.memory_space<vmem>>, %arg4: memref<32x64xf32, #tpu.memory_space<vmem>>, %arg5: memref<1x64xf32, #tpu.memory_space<vmem>>, %arg6: memref<32x32xf32, #tpu.memory_space<vmem>>, %arg7: memref<1x32xf32, #tpu.memory_space<vmem>>, %arg8: memref<32x32xf32, #tpu.memory_space<vmem>>, %arg9: memref<1x32xf32, #tpu.memory_space<vmem>>, %arg10: memref<1x32xf32, #tpu.memory_space<vmem>>, %arg11: memref<1x32xf32, #tpu.memory_space<vmem>>, %arg12: memref<32x64xf32, #tpu.memory_space<vmem>>, %arg13: memref<1x64xf32, #tpu.memory_space<vmem>>, %arg14: memref<64x32xf32, #tpu.memory_space<vmem>>, %arg15: memref<1x32xf32, #tpu.memory_space<vmem>>, %arg16: memref<1x32xf32, #tpu.memory_space<vmem>>, %arg17: memref<1x32xf32, #tpu.memory_space<vmem>>, %arg18: memref<1x16x32xf32, #tpu.memory_space<vmem>>) attributes {dimension_semantics = [#tpu.dimension_semantics<parallel>], iteration_bounds = array<i64: 2>, scalar_prefetch = 0 : i64, scratch_operands = 0 : i64, tpu.core_type = #tpu.core_type<tc>, window_params = [{transform_indices = @transform_0, window_bounds = array<i64: 1, 16, 32>}, {transform_indices = @transform_1, window_bounds = array<i64: 1, 16, 32>}, {transform_indices = @transform_2, window_bounds = array<i64: 1, 1, 16>}, {pipeline_mode = #tpu.pipeline_mode<synchronous>, transform_indices = @transform_3, window_bounds = array<i64: 32, 64>}, {pipeline_mode = #tpu.pipeline_mode<synchronous>, transform_indices = @transform_4, window_bounds = array<i64: 1, 64>}, {pipeline_mode = #tpu.pipeline_mode<synchronous>, transform_indices = @transform_5, window_bounds = array<i64: 32, 32>}, {pipeline_mode = #tpu.pipeline_mode<synchronous>, transform_indices = @transform_6, window_bounds = array<i64: 1, 32>}, {pipeline_mode = #tpu.pipeline_mode<synchronous>, transform_indices = @transform_7, window_bounds = array<i64: 32, 32>}, {pipeline_mode = #tpu.pipeline_mode<synchronous>, transform_indices = @transform_8, window_bounds = array<i64: 1, 32>}, {pipeline_mode = #tpu.pipeline_mode<synchronous>, transform_indices = @transform_9, window_bounds = array<i64: 1, 32>}, {pipeline_mode = #tpu.pipeline_mode<synchronous>, transform_indices = @transform_10, window_bounds = array<i64: 1, 32>}, {pipeline_mode = #tpu.pipeline_mode<synchronous>, transform_indices = @transform_11, window_bounds = array<i64: 32, 64>}, {pipeline_mode = #tpu.pipeline_mode<synchronous>, transform_indices = @transform_12, window_bounds = array<i64: 1, 64>}, {pipeline_mode = #tpu.pipeline_mode<synchronous>, transform_indices = @transform_13, window_bounds = array<i64: 64, 32>}, {pipeline_mode = #tpu.pipeline_mode<synchronous>, transform_indices = @transform_14, window_bounds = array<i64: 1, 32>}, {pipeline_mode = #tpu.pipeline_mode<synchronous>, transform_indices = @transform_15, window_bounds = array<i64: 1, 32>}, {pipeline_mode = #tpu.pipeline_mode<synchronous>, transform_indices = @transform_16, window_bounds = array<i64: 1, 32>}, {transform_indices = @transform_17, window_bounds = array<i64: 1, 16, 32>}]} {
    %c0 = arith.constant 0 : index
    %c0_0 = arith.constant 0 : index
    %c0_1 = arith.constant 0 : index
    %0 = vector.load %arg1[%c0, %c0_0, %c0_1] : memref<1x16x32xf32, #tpu.memory_space<vmem>>, vector<1x16x32xf32>
    %1 = vector.shape_cast %0 : vector<1x16x32xf32> to vector<16x32xf32>
    %c0_2 = arith.constant 0 : index
    %c0_3 = arith.constant 0 : index
    %c0_4 = arith.constant 0 : index
    %2 = vector.load %arg2[%c0_2, %c0_3, %c0_4] : memref<1x16x32xf32, #tpu.memory_space<vmem>>, vector<1x16x32xf32>
    %3 = vector.shape_cast %2 : vector<1x16x32xf32> to vector<16x32xf32>
    %4 = arith.addf %1, %3 : vector<16x32xf32>
    %c0_5 = arith.constant 0 : index
    %c0_6 = arith.constant 0 : index
    %c0_7 = arith.constant 0 : index
    %5 = vector.load %arg3[%c0_5, %c0_6, %c0_7] : memref<1x1x16xf32, #tpu.memory_space<vmem>>, vector<1x1x16xf32>
    %6 = vector.shape_cast %5 : vector<1x1x16xf32> to vector<1x16xf32>
    %c0_8 = arith.constant 0 : index
    %c0_9 = arith.constant 0 : index
    %7 = vector.load %arg4[%c0_8, %c0_9] : memref<32x64xf32, #tpu.memory_space<vmem>>, vector<32x64xf32>
    %cst = arith.constant dense<0.000000e+00> : vector<16x64xf32>
    %8 = tpu.matmul %4, %7, %cst {dimension_numbers = #tpu.dot_dimension_numbers<[1], [0], [0], [1], [0, 0, 1, 1], [], []>} : vector<16x32xf32>, vector<32x64xf32>, vector<16x64xf32> -> vector<16x64xf32>
    %c0_10 = arith.constant 0 : index
    %c0_11 = arith.constant 0 : index
    %9 = vector.load %arg5[%c0_10, %c0_11] : memref<1x64xf32, #tpu.memory_space<vmem>>, vector<1x64xf32>
    %10 = vector.broadcast %9 : vector<1x64xf32> to vector<16x64xf32>
    %11 = arith.addf %8, %10 : vector<16x64xf32>
    %c0_12 = arith.constant 0 : index
    %c0_13 = arith.constant 0 : index
    %12 = vector.load %arg6[%c0_12, %c0_13] : memref<32x32xf32, #tpu.memory_space<vmem>>, vector<32x32xf32>
    %cst_14 = arith.constant dense<0.000000e+00> : vector<16x32xf32>
    %13 = tpu.matmul %1, %12, %cst_14 {dimension_numbers = #tpu.dot_dimension_numbers<[1], [0], [0], [1], [0, 0, 1, 1], [], []>} : vector<16x32xf32>, vector<32x32xf32>, vector<16x32xf32> -> vector<16x32xf32>
    %c0_15 = arith.constant 0 : index
    %c0_16 = arith.constant 0 : index
    %14 = vector.load %arg7[%c0_15, %c0_16] : memref<1x32xf32, #tpu.memory_space<vmem>>, vector<1x32xf32>
    %15 = vector.broadcast %14 : vector<1x32xf32> to vector<16x32xf32>
    %16 = arith.addf %13, %15 : vector<16x32xf32>
    %17 = vector.extract_strided_slice %11 {offsets = [0, 0], sizes = [16, 8], strides = [1, 1]} : vector<16x64xf32> to vector<16x8xf32>
    %18 = vector.extract_strided_slice %11 {offsets = [0, 32], sizes = [16, 8], strides = [1, 1]} : vector<16x64xf32> to vector<16x8xf32>
    %19 = vector.extract_strided_slice %16 {offsets = [0, 0], sizes = [16, 8], strides = [1, 1]} : vector<16x32xf32> to vector<16x8xf32>
    "tpu.trace_start"() <{level = 10 : i32, message = "qd,kd->qk"}> : () -> ()
    %cst_17 = arith.constant dense<0.000000e+00> : vector<16x16xf32>
    %20 = tpu.matmul %17, %18, %cst_17 {dimension_numbers = #tpu.dot_dimension_numbers<[1], [1], [0], [0], [0, 0, 1, 0], [], []>} : vector<16x8xf32>, vector<16x8xf32>, vector<16x16xf32> -> vector<16x16xf32>
    "tpu.trace_stop"() : () -> ()
    %cst_18 = arith.constant 0.353553385 : f32
    %21 = vector.broadcast %cst_18 : f32 to vector<16x16xf32>
    %22 = arith.mulf %20, %21 : vector<16x16xf32>
    %23 = vector.broadcast %6 : vector<1x16xf32> to vector<16x16xf32>
    %24 = arith.addf %22, %23 : vector<16x16xf32>
    %cst_19 = arith.constant dense<0xFF800000> : vector<16xf32>
    %25 = vector.multi_reduction <maximumf>, %24, %cst_19 [1] : vector<16x16xf32> to vector<16xf32>
    %26 = vector.shape_cast %25 : vector<16xf32> to vector<16x1xf32>
    %27 = vector.broadcast %26 : vector<16x1xf32> to vector<16x16xf32>
    %28 = arith.subf %24, %27 : vector<16x16xf32>
    %29 = math.exp %28 : vector<16x16xf32>
    %cst_20 = arith.constant dense<0.000000e+00> : vector<16xf32>
    %30 = vector.multi_reduction <add>, %29, %cst_20 [1] : vector<16x16xf32> to vector<16xf32>
    %31 = vector.shape_cast %30 : vector<16xf32> to vector<16x1xf32>
    %32 = tpu.reciprocal %31 {approx = true} : vector<16x1xf32> -> vector<16x1xf32>
    %33 = vector.broadcast %32 : vector<16x1xf32> to vector<16x16xf32>
    %34 = arith.mulf %29, %33 : vector<16x16xf32>
    %cst_21 = arith.constant dense<0.000000e+00> : vector<16x8xf32>
    %35 = tpu.matmul %34, %19, %cst_21 {dimension_numbers = #tpu.dot_dimension_numbers<[1], [0], [0], [1], [0, 0, 1, 1], [], []>} : vector<16x16xf32>, vector<16x8xf32>, vector<16x8xf32> -> vector<16x8xf32>
    %36 = vector.extract_strided_slice %11 {offsets = [0, 8], sizes = [16, 8], strides = [1, 1]} : vector<16x64xf32> to vector<16x8xf32>
    %37 = vector.extract_strided_slice %11 {offsets = [0, 40], sizes = [16, 8], strides = [1, 1]} : vector<16x64xf32> to vector<16x8xf32>
    %38 = vector.extract_strided_slice %16 {offsets = [0, 8], sizes = [16, 8], strides = [1, 1]} : vector<16x32xf32> to vector<16x8xf32>
    "tpu.trace_start"() <{level = 10 : i32, message = "qd,kd->qk"}> : () -> ()
    %cst_22 = arith.constant dense<0.000000e+00> : vector<16x16xf32>
    %39 = tpu.matmul %36, %37, %cst_22 {dimension_numbers = #tpu.dot_dimension_numbers<[1], [1], [0], [0], [0, 0, 1, 0], [], []>} : vector<16x8xf32>, vector<16x8xf32>, vector<16x16xf32> -> vector<16x16xf32>
    "tpu.trace_stop"() : () -> ()
    %cst_23 = arith.constant 0.353553385 : f32
    %40 = vector.broadcast %cst_23 : f32 to vector<16x16xf32>
    %41 = arith.mulf %39, %40 : vector<16x16xf32>
    %42 = vector.broadcast %6 : vector<1x16xf32> to vector<16x16xf32>
    %43 = arith.addf %41, %42 : vector<16x16xf32>
    %cst_24 = arith.constant dense<0xFF800000> : vector<16xf32>
    %44 = vector.multi_reduction <maximumf>, %43, %cst_24 [1] : vector<16x16xf32> to vector<16xf32>
    %45 = vector.shape_cast %44 : vector<16xf32> to vector<16x1xf32>
    %46 = vector.broadcast %45 : vector<16x1xf32> to vector<16x16xf32>
    %47 = arith.subf %43, %46 : vector<16x16xf32>
    %48 = math.exp %47 : vector<16x16xf32>
    %cst_25 = arith.constant dense<0.000000e+00> : vector<16xf32>
    %49 = vector.multi_reduction <add>, %48, %cst_25 [1] : vector<16x16xf32> to vector<16xf32>
    %50 = vector.shape_cast %49 : vector<16xf32> to vector<16x1xf32>
    %51 = tpu.reciprocal %50 {approx = true} : vector<16x1xf32> -> vector<16x1xf32>
    %52 = vector.broadcast %51 : vector<16x1xf32> to vector<16x16xf32>
    %53 = arith.mulf %48, %52 : vector<16x16xf32>
    %cst_26 = arith.constant dense<0.000000e+00> : vector<16x8xf32>
    %54 = tpu.matmul %53, %38, %cst_26 {dimension_numbers = #tpu.dot_dimension_numbers<[1], [0], [0], [1], [0, 0, 1, 1], [], []>} : vector<16x16xf32>, vector<16x8xf32>, vector<16x8xf32> -> vector<16x8xf32>
    %55 = vector.extract_strided_slice %11 {offsets = [0, 16], sizes = [16, 8], strides = [1, 1]} : vector<16x64xf32> to vector<16x8xf32>
    %56 = vector.extract_strided_slice %11 {offsets = [0, 48], sizes = [16, 8], strides = [1, 1]} : vector<16x64xf32> to vector<16x8xf32>
    %57 = vector.extract_strided_slice %16 {offsets = [0, 16], sizes = [16, 8], strides = [1, 1]} : vector<16x32xf32> to vector<16x8xf32>
    "tpu.trace_start"() <{level = 10 : i32, message = "qd,kd->qk"}> : () -> ()
    %cst_27 = arith.constant dense<0.000000e+00> : vector<16x16xf32>
    %58 = tpu.matmul %55, %56, %cst_27 {dimension_numbers = #tpu.dot_dimension_numbers<[1], [1], [0], [0], [0, 0, 1, 0], [], []>} : vector<16x8xf32>, vector<16x8xf32>, vector<16x16xf32> -> vector<16x16xf32>
    "tpu.trace_stop"() : () -> ()
    %cst_28 = arith.constant 0.353553385 : f32
    %59 = vector.broadcast %cst_28 : f32 to vector<16x16xf32>
    %60 = arith.mulf %58, %59 : vector<16x16xf32>
    %61 = vector.broadcast %6 : vector<1x16xf32> to vector<16x16xf32>
    %62 = arith.addf %60, %61 : vector<16x16xf32>
    %cst_29 = arith.constant dense<0xFF800000> : vector<16xf32>
    %63 = vector.multi_reduction <maximumf>, %62, %cst_29 [1] : vector<16x16xf32> to vector<16xf32>
    %64 = vector.shape_cast %63 : vector<16xf32> to vector<16x1xf32>
    %65 = vector.broadcast %64 : vector<16x1xf32> to vector<16x16xf32>
    %66 = arith.subf %62, %65 : vector<16x16xf32>
    %67 = math.exp %66 : vector<16x16xf32>
    %cst_30 = arith.constant dense<0.000000e+00> : vector<16xf32>
    %68 = vector.multi_reduction <add>, %67, %cst_30 [1] : vector<16x16xf32> to vector<16xf32>
    %69 = vector.shape_cast %68 : vector<16xf32> to vector<16x1xf32>
    %70 = tpu.reciprocal %69 {approx = true} : vector<16x1xf32> -> vector<16x1xf32>
    %71 = vector.broadcast %70 : vector<16x1xf32> to vector<16x16xf32>
    %72 = arith.mulf %67, %71 : vector<16x16xf32>
    %cst_31 = arith.constant dense<0.000000e+00> : vector<16x8xf32>
    %73 = tpu.matmul %72, %57, %cst_31 {dimension_numbers = #tpu.dot_dimension_numbers<[1], [0], [0], [1], [0, 0, 1, 1], [], []>} : vector<16x16xf32>, vector<16x8xf32>, vector<16x8xf32> -> vector<16x8xf32>
    %74 = vector.extract_strided_slice %11 {offsets = [0, 24], sizes = [16, 8], strides = [1, 1]} : vector<16x64xf32> to vector<16x8xf32>
    %75 = vector.extract_strided_slice %11 {offsets = [0, 56], sizes = [16, 8], strides = [1, 1]} : vector<16x64xf32> to vector<16x8xf32>
    %76 = vector.extract_strided_slice %16 {offsets = [0, 24], sizes = [16, 8], strides = [1, 1]} : vector<16x32xf32> to vector<16x8xf32>
    "tpu.trace_start"() <{level = 10 : i32, message = "qd,kd->qk"}> : () -> ()
    %cst_32 = arith.constant dense<0.000000e+00> : vector<16x16xf32>
    %77 = tpu.matmul %74, %75, %cst_32 {dimension_numbers = #tpu.dot_dimension_numbers<[1], [1], [0], [0], [0, 0, 1, 0], [], []>} : vector<16x8xf32>, vector<16x8xf32>, vector<16x16xf32> -> vector<16x16xf32>
    "tpu.trace_stop"() : () -> ()
    %cst_33 = arith.constant 0.353553385 : f32
    %78 = vector.broadcast %cst_33 : f32 to vector<16x16xf32>
    %79 = arith.mulf %77, %78 : vector<16x16xf32>
    %80 = vector.broadcast %6 : vector<1x16xf32> to vector<16x16xf32>
    %81 = arith.addf %79, %80 : vector<16x16xf32>
    %cst_34 = arith.constant dense<0xFF800000> : vector<16xf32>
    %82 = vector.multi_reduction <maximumf>, %81, %cst_34 [1] : vector<16x16xf32> to vector<16xf32>
    %83 = vector.shape_cast %82 : vector<16xf32> to vector<16x1xf32>
    %84 = vector.broadcast %83 : vector<16x1xf32> to vector<16x16xf32>
    %85 = arith.subf %81, %84 : vector<16x16xf32>
    %86 = math.exp %85 : vector<16x16xf32>
    %cst_35 = arith.constant dense<0.000000e+00> : vector<16xf32>
    %87 = vector.multi_reduction <add>, %86, %cst_35 [1] : vector<16x16xf32> to vector<16xf32>
    %88 = vector.shape_cast %87 : vector<16xf32> to vector<16x1xf32>
    %89 = tpu.reciprocal %88 {approx = true} : vector<16x1xf32> -> vector<16x1xf32>
    %90 = vector.broadcast %89 : vector<16x1xf32> to vector<16x16xf32>
    %91 = arith.mulf %86, %90 : vector<16x16xf32>
    %cst_36 = arith.constant dense<0.000000e+00> : vector<16x8xf32>
    %92 = tpu.matmul %91, %76, %cst_36 {dimension_numbers = #tpu.dot_dimension_numbers<[1], [0], [0], [1], [0, 0, 1, 1], [], []>} : vector<16x16xf32>, vector<16x8xf32>, vector<16x8xf32> -> vector<16x8xf32>
    %93 = tpu.concatenate %35, %54, %73, %92 in 1 : vector<16x8xf32>, vector<16x8xf32>, vector<16x8xf32>, vector<16x8xf32> -> vector<16x32xf32>
    %c0_37 = arith.constant 0 : index
    %c0_38 = arith.constant 0 : index
    %94 = vector.load %arg8[%c0_37, %c0_38] : memref<32x32xf32, #tpu.memory_space<vmem>>, vector<32x32xf32>
    %cst_39 = arith.constant dense<0.000000e+00> : vector<16x32xf32>
    %95 = tpu.matmul %93, %94, %cst_39 {dimension_numbers = #tpu.dot_dimension_numbers<[1], [0], [0], [1], [0, 0, 1, 1], [], []>} : vector<16x32xf32>, vector<32x32xf32>, vector<16x32xf32> -> vector<16x32xf32>
    %c0_40 = arith.constant 0 : index
    %c0_41 = arith.constant 0 : index
    %96 = vector.load %arg9[%c0_40, %c0_41] : memref<1x32xf32, #tpu.memory_space<vmem>>, vector<1x32xf32>
    %97 = vector.broadcast %96 : vector<1x32xf32> to vector<16x32xf32>
    %98 = arith.addf %95, %97 : vector<16x32xf32>
    %99 = arith.addf %1, %98 : vector<16x32xf32>
    %c0_42 = arith.constant 0 : index
    %c0_43 = arith.constant 0 : index
    %100 = vector.load %arg10[%c0_42, %c0_43] : memref<1x32xf32, #tpu.memory_space<vmem>>, vector<1x32xf32>
    %c0_44 = arith.constant 0 : index
    %c0_45 = arith.constant 0 : index
    %101 = vector.load %arg11[%c0_44, %c0_45] : memref<1x32xf32, #tpu.memory_space<vmem>>, vector<1x32xf32>
    %cst_46 = arith.constant dense<0.000000e+00> : vector<16xf32>
    %102 = vector.multi_reduction <add>, %99, %cst_46 [1] : vector<16x32xf32> to vector<16xf32>
    %103 = vector.shape_cast %102 : vector<16xf32> to vector<16x1xf32>
    %cst_47 = arith.constant 3.200000e+01 : f32
    %104 = vector.broadcast %cst_47 : f32 to vector<16x1xf32>
    %105 = arith.divf %103, %104 : vector<16x1xf32>
    %106 = vector.broadcast %105 : vector<16x1xf32> to vector<16x32xf32>
    %107 = arith.subf %99, %106 : vector<16x32xf32>
    %108 = arith.mulf %107, %107 : vector<16x32xf32>
    %cst_48 = arith.constant dense<0.000000e+00> : vector<16xf32>
    %109 = vector.multi_reduction <add>, %108, %cst_48 [1] : vector<16x32xf32> to vector<16xf32>
    %110 = vector.shape_cast %109 : vector<16xf32> to vector<16x1xf32>
    %cst_49 = arith.constant 3.200000e+01 : f32
    %111 = vector.broadcast %cst_49 : f32 to vector<16x1xf32>
    %112 = arith.divf %110, %111 : vector<16x1xf32>
    %113 = vector.broadcast %105 : vector<16x1xf32> to vector<16x32xf32>
    %114 = arith.subf %99, %113 : vector<16x32xf32>
    %cst_50 = arith.constant 9.99999974E-6 : f32
    %115 = vector.broadcast %cst_50 : f32 to vector<16x1xf32>
    %116 = arith.addf %112, %115 : vector<16x1xf32>
    %117 = math.rsqrt %116 : vector<16x1xf32>
    %118 = vector.broadcast %117 : vector<16x1xf32> to vector<16x32xf32>
    %119 = arith.mulf %114, %118 : vector<16x32xf32>
    %120 = vector.broadcast %100 : vector<1x32xf32> to vector<16x32xf32>
    %121 = arith.mulf %119, %120 : vector<16x32xf32>
    %122 = vector.broadcast %101 : vector<1x32xf32> to vector<16x32xf32>
    %123 = arith.addf %121, %122 : vector<16x32xf32>
    %c0_51 = arith.constant 0 : index
    %c0_52 = arith.constant 0 : index
    %124 = vector.load %arg12[%c0_51, %c0_52] : memref<32x64xf32, #tpu.memory_space<vmem>>, vector<32x64xf32>
    %cst_53 = arith.constant dense<0.000000e+00> : vector<16x64xf32>
    %125 = tpu.matmul %123, %124, %cst_53 {dimension_numbers = #tpu.dot_dimension_numbers<[1], [0], [0], [1], [0, 0, 1, 1], [], []>} : vector<16x32xf32>, vector<32x64xf32>, vector<16x64xf32> -> vector<16x64xf32>
    %c0_54 = arith.constant 0 : index
    %c0_55 = arith.constant 0 : index
    %126 = vector.load %arg13[%c0_54, %c0_55] : memref<1x64xf32, #tpu.memory_space<vmem>>, vector<1x64xf32>
    %127 = vector.broadcast %126 : vector<1x64xf32> to vector<16x64xf32>
    %128 = arith.addf %125, %127 : vector<16x64xf32>
    %cst_56 = arith.constant 0.000000e+00 : f32
    %129 = vector.broadcast %cst_56 : f32 to vector<16x64xf32>
    %130 = arith.maximumf %128, %129 : vector<16x64xf32>
    %c0_57 = arith.constant 0 : index
    %c0_58 = arith.constant 0 : index
    %131 = vector.load %arg14[%c0_57, %c0_58] : memref<64x32xf32, #tpu.memory_space<vmem>>, vector<64x32xf32>
    %cst_59 = arith.constant dense<0.000000e+00> : vector<16x32xf32>
    %132 = tpu.matmul %130, %131, %cst_59 {dimension_numbers = #tpu.dot_dimension_numbers<[1], [0], [0], [1], [0, 0, 1, 1], [], []>} : vector<16x64xf32>, vector<64x32xf32>, vector<16x32xf32> -> vector<16x32xf32>
    %c0_60 = arith.constant 0 : index
    %c0_61 = arith.constant 0 : index
    %133 = vector.load %arg15[%c0_60, %c0_61] : memref<1x32xf32, #tpu.memory_space<vmem>>, vector<1x32xf32>
    %134 = vector.broadcast %133 : vector<1x32xf32> to vector<16x32xf32>
    %135 = arith.addf %132, %134 : vector<16x32xf32>
    %136 = arith.addf %123, %135 : vector<16x32xf32>
    %c0_62 = arith.constant 0 : index
    %c0_63 = arith.constant 0 : index
    %137 = vector.load %arg16[%c0_62, %c0_63] : memref<1x32xf32, #tpu.memory_space<vmem>>, vector<1x32xf32>
    %c0_64 = arith.constant 0 : index
    %c0_65 = arith.constant 0 : index
    %138 = vector.load %arg17[%c0_64, %c0_65] : memref<1x32xf32, #tpu.memory_space<vmem>>, vector<1x32xf32>
    %cst_66 = arith.constant dense<0.000000e+00> : vector<16xf32>
    %139 = vector.multi_reduction <add>, %136, %cst_66 [1] : vector<16x32xf32> to vector<16xf32>
    %140 = vector.shape_cast %139 : vector<16xf32> to vector<16x1xf32>
    %cst_67 = arith.constant 3.200000e+01 : f32
    %141 = vector.broadcast %cst_67 : f32 to vector<16x1xf32>
    %142 = arith.divf %140, %141 : vector<16x1xf32>
    %143 = vector.broadcast %142 : vector<16x1xf32> to vector<16x32xf32>
    %144 = arith.subf %136, %143 : vector<16x32xf32>
    %145 = arith.mulf %144, %144 : vector<16x32xf32>
    %cst_68 = arith.constant dense<0.000000e+00> : vector<16xf32>
    %146 = vector.multi_reduction <add>, %145, %cst_68 [1] : vector<16x32xf32> to vector<16xf32>
    %147 = vector.shape_cast %146 : vector<16xf32> to vector<16x1xf32>
    %cst_69 = arith.constant 3.200000e+01 : f32
    %148 = vector.broadcast %cst_69 : f32 to vector<16x1xf32>
    %149 = arith.divf %147, %148 : vector<16x1xf32>
    %150 = vector.broadcast %142 : vector<16x1xf32> to vector<16x32xf32>
    %151 = arith.subf %136, %150 : vector<16x32xf32>
    %cst_70 = arith.constant 9.99999974E-6 : f32
    %152 = vector.broadcast %cst_70 : f32 to vector<16x1xf32>
    %153 = arith.addf %149, %152 : vector<16x1xf32>
    %154 = math.rsqrt %153 : vector<16x1xf32>
    %155 = vector.broadcast %154 : vector<16x1xf32> to vector<16x32xf32>
    %156 = arith.mulf %151, %155 : vector<16x32xf32>
    %157 = vector.broadcast %137 : vector<1x32xf32> to vector<16x32xf32>
    %158 = arith.mulf %156, %157 : vector<16x32xf32>
    %159 = vector.broadcast %138 : vector<1x32xf32> to vector<16x32xf32>
    %160 = arith.addf %158, %159 : vector<16x32xf32>
    %c0_71 = arith.constant 0 : index
    %c0_72 = arith.constant 0 : index
    %c0_73 = arith.constant 0 : index
    %161 = vector.load %arg18[%c0_71, %c0_72, %c0_73] : memref<1x16x32xf32, #tpu.memory_space<vmem>>, vector<1x16x32xf32>
    %162 = vector.shape_cast %161 : vector<1x16x32xf32> to vector<16x32xf32>
    %163 = vector.shape_cast %160 : vector<16x32xf32> to vector<1x16x32xf32>
    tpu.vector_store %arg18[%c0_71, %c0_72, %c0_73], %163 {strides = array<i32>} : memref<1x16x32xf32, #tpu.memory_space<vmem>>, vector<1x16x32xf32>,
    return
  }
  func.func @transform_0(%arg0: i32) -> (i32, i32, i32) {
    %c0_i32 = arith.constant 0 : i32
    %c0_i32_0 = arith.constant 0 : i32
    %c0_i32_1 = arith.constant 0 : i32
    return %arg0, %c0_i32, %c0_i32_0 : i32, i32, i32
  }
  func.func @transform_1(%arg0: i32) -> (i32, i32, i32) {
    %c0_i32 = arith.constant 0 : i32
    %c0_i32_0 = arith.constant 0 : i32
    %c0_i32_1 = arith.constant 0 : i32
    return %arg0, %c0_i32, %c0_i32_0 : i32, i32, i32
  }
  func.func @transform_2(%arg0: i32) -> (i32, i32, i32) {
    %c0_i32 = arith.constant 0 : i32
    %c0_i32_0 = arith.constant 0 : i32
    %c0_i32_1 = arith.constant 0 : i32
    return %arg0, %c0_i32, %c0_i32_0 : i32, i32, i32
  }
  func.func @transform_3(%arg0: i32) -> (i32, i32) {
    %c0_i32 = arith.constant 0 : i32
    %c0_i32_0 = arith.constant 0 : i32
    %c0_i32_1 = arith.constant 0 : i32
    return %c0_i32, %c0_i32_0 : i32, i32
  }
  func.func @transform_4(%arg0: i32) -> (i32, i32) {
    %c0_i32 = arith.constant 0 : i32
    %c0_i32_0 = arith.constant 0 : i32
    %c0_i32_1 = arith.constant 0 : i32
    return %c0_i32, %c0_i32_0 : i32, i32
  }
  func.func @transform_5(%arg0: i32) -> (i32, i32) {
    %c0_i32 = arith.constant 0 : i32
    %c0_i32_0 = arith.constant 0 : i32
    %c0_i32_1 = arith.constant 0 : i32
    return %c0_i32, %c0_i32_0 : i32, i32
  }
  func.func @transform_6(%arg0: i32) -> (i32, i32) {
    %c0_i32 = arith.constant 0 : i32
    %c0_i32_0 = arith.constant 0 : i32
    %c0_i32_1 = arith.constant 0 : i32
    return %c0_i32, %c0_i32_0 : i32, i32
  }
  func.func @transform_7(%arg0: i32) -> (i32, i32) {
    %c0_i32 = arith.constant 0 : i32
    %c0_i32_0 = arith.constant 0 : i32
    %c0_i32_1 = arith.constant 0 : i32
    return %c0_i32, %c0_i32_0 : i32, i32
  }
  func.func @transform_8(%arg0: i32) -> (i32, i32) {
    %c0_i32 = arith.constant 0 : i32
    %c0_i32_0 = arith.constant 0 : i32
    %c0_i32_1 = arith.constant 0 : i32
    return %c0_i32, %c0_i32_0 : i32, i32
  }
  func.func @transform_9(%arg0: i32) -> (i32, i32) {
    %c0_i32 = arith.constant 0 : i32
    %c0_i32_0 = arith.constant 0 : i32
    %c0_i32_1 = arith.constant 0 : i32
    return %c0_i32, %c0_i32_0 : i32, i32
  }
  func.func @transform_10(%arg0: i32) -> (i32, i32) {
    %c0_i32 = arith.constant 0 : i32
    %c0_i32_0 = arith.constant 0 : i32
    %c0_i32_1 = arith.constant 0 : i32
    return %c0_i32, %c0_i32_0 : i32, i32
  }
  func.func @transform_11(%arg0: i32) -> (i32, i32) {
    %c0_i32 = arith.constant 0 : i32
    %c0_i32_0 = arith.constant 0 : i32
    %c0_i32_1 = arith.constant 0 : i32
    return %c0_i32, %c0_i32_0 : i32, i32
  }
  func.func @transform_12(%arg0: i32) -> (i32, i32) {
    %c0_i32 = arith.constant 0 : i32
    %c0_i32_0 = arith.constant 0 : i32
    %c0_i32_1 = arith.constant 0 : i32
    return %c0_i32, %c0_i32_0 : i32, i32
  }
  func.func @transform_13(%arg0: i32) -> (i32, i32) {
    %c0_i32 = arith.constant 0 : i32
    %c0_i32_0 = arith.constant 0 : i32
    %c0_i32_1 = arith.constant 0 : i32
    return %c0_i32, %c0_i32_0 : i32, i32
  }
  func.func @transform_14(%arg0: i32) -> (i32, i32) {
    %c0_i32 = arith.constant 0 : i32
    %c0_i32_0 = arith.constant 0 : i32
    %c0_i32_1 = arith.constant 0 : i32
    return %c0_i32, %c0_i32_0 : i32, i32
  }
  func.func @transform_15(%arg0: i32) -> (i32, i32) {
    %c0_i32 = arith.constant 0 : i32
    %c0_i32_0 = arith.constant 0 : i32
    %c0_i32_1 = arith.constant 0 : i32
    return %c0_i32, %c0_i32_0 : i32, i32
  }
  func.func @transform_16(%arg0: i32) -> (i32, i32) {
    %c0_i32 = arith.constant 0 : i32
    %c0_i32_0 = arith.constant 0 : i32
    %c0_i32_1 = arith.constant 0 : i32
    return %c0_i32, %c0_i32_0 : i32, i32
  }
  func.func @transform_17(%arg0: i32) -> (i32, i32, i32) {
    %c0_i32 = arith.constant 0 : i32
    %c0_i32_0 = arith.constant 0 : i32
    %c0_i32_1 = arith.constant 0 : i32
    return %arg0, %c0_i32, %c0_i32_0 : i32, i32, i32
  }
}

</mosaic_0001>

<bundles_post_ra>
// kernel: transformer_encoder_layer.1
= control target key start
LH: loop header
LB: loop body
LE: loop exit
PB: predicated region body
PF: predicated region fallthrough
CT: control target
= control target key end

     0   :  { %s2612_s24 = smov 0   ;;  %s2885_s0 = inlined_call_operand.vmem [shape: f32[2,16,32], index: 0, kind: input, shape index: {}]   ;;  %s2886_s1 = inlined_call_operand.vmem [shape: f32[2,16,32], index: 1, kind: input, shape index: {}]   ;;  %s2887_s2 = inlined_call_operand.vmem [shape: f32[2,1,16], index: 2, kind: input, shape index: {}]   ;;  %s2888_s3 = inlined_call_operand.vmem [shape: f32[32,64], index: 3, kind: input, shape index: {}]   ;;  %s2889_s4 = inlined_call_operand.vmem [shape: f32[1,64], index: 4, kind: input, shape index: {}]   ;;  %s2890_s5 = inlined_call_operand.vmem [shape: f32[32,32], index: 5, kind: input, shape index: {}]   ;;  %s2891_s6 = inlined_call_operand.vmem [shape: f32[1,32], index: 6, kind: input, shape index: {}]   ;;  %s2892_s7 = inlined_call_operand.vmem [shape: f32[32,32], index: 7, kind: input, shape index: {}]   ;;  %s2893_s8 = inlined_call_operand.vmem [shape: f32[1,32], index: 8, kind: input, shape index: {}]   ;;  %s2894_s9 = inlined_call_operand.vmem [shape: f32[1,32], index: 9, kind: input, shape index: {}]   ;;  %s2895_s10 = inlined_call_operand.vmem [shape: f32[1,32], index: 10, kind: input, shape index: {}]   ;;  %s2896_s11 = inlined_call_operand.vmem [shape: f32[32,64], index: 11, kind: input, shape index: {}]   ;;  %s2897_s12 = inlined_call_operand.vmem [shape: f32[1,64], index: 12, kind: input, shape index: {}]   ;;  %s2898_s13 = inlined_call_operand.vmem [shape: f32[64,32], index: 13, kind: input, shape index: {}]   ;;  %s2899_s14 = inlined_call_operand.vmem [shape: f32[1,32], index: 14, kind: input, shape index: {}]   ;;  %s2900_s15 = inlined_call_operand.vmem [shape: f32[1,32], index: 15, kind: input, shape index: {}]   ;;  %s2901_s16 = inlined_call_operand.vmem [shape: f32[1,32], index: 16, kind: input, shape index: {}]   ;;  %s2902_s17 = inlined_call_operand.vmem [shape: f32[2,16,32], index: 17, kind: output, shape index: {}]  }
   0x1   :  { %2903 = sst [smem:[#allocation2_spill]] %s2885_s0 }
   0x2   :  { %2904 = sst [smem:[#allocation3_spill]] %s2886_s1 }
   0x3 LB: > { %s2078_s25 = sadd.s32 4294967295, %s2510_s24   ;;  %p2082_p0 = scmp.ge.s32.totalorder %s2510_s24, 1  ;;  %s2510_s24 = sphi %s2612_s24, %s27_s24  }
   0x4   : > { %p505_p1 = scmp.lt.s32.totalorder %s2510_s24, 3 }
   0x6   : > { %p506_p2 = pnand %p2082_p0, %p505_p1 }
   0x7   : > { %v590_v0 = vld [vmem:[%s2888_s3] sm:$0xff] (!%p506_p2)  ;;  %v591_v1 = vld [vmem:[%s2888_s3 + $0x8] sm:$0xff] (!%p506_p2)  ;;  %v592_v2 = vld [vmem:[%s2888_s3 + $0x10] sm:$0xff] (!%p506_p2)  ;;  %p565_p3 = scmp.lt.s32.totalorder (!%p506_p2), %s2078_s25, 1  ;;  %s2905_s22 = sld [smem:[#allocation2_spill]] (!%p506_p2)  ;;  %vm601_vm0 = vcmask (!%p506_p2), 261120  }
   0x8   : > { %509 = sbr.rel (%p506_p2) target bundleno = 4141 (0x102d), region = 88  ;;  %v2323_v3 = vpack.c.bf16 (!%p506_p2), %v591_v1, %v590_v0  ;;  %v593_v4 = vld [vmem:[%s2888_s3 + $0x18] sm:$0xff] (!%p506_p2)  ;;  %s2906_s28 = sld [smem:[#allocation3_spill]] (!%p506_p2)  ;;  %v2089_v12 = vld [vmem:[%s2889_s4] ss:$0 sm:$0xff] (!%p506_p2)  ;;  %vm781_vm1 = vcmask (!%p506_p2), 64512  }
   0x9   : > { %v2327_v5 = vpack.c.bf16 (!%p506_p2), %v593_v4, %v592_v2  ;;  %v683_v18 = vld [vmem:[%s2890_s5] sm:$0xff] (!%p506_p2)  ;;  %v684_v19 = vld [vmem:[%s2890_s5 + $0x8] sm:$0xff] (!%p506_p2)  ;;  %v685_v20 = vld [vmem:[%s2890_s5 + $0x10] sm:$0xff] (!%p506_p2)  ;;  %s2512_s26 = smov (!%p506_p2), 96   ;;  %vm875_vm3 = vcmask (!%p506_p2), 130048   ;;  %s2513_s19 = smov (!%p506_p2), 88  }
   0xa   : > { %2324 = vmatprep.subr.bf16.mxu1 (!%p506_p2), %v2323_v3  ;;  %v2331_v21 = vpack.c.bf16 (!%p506_p2), %v684_v19, %v683_v18  ;;  %v686_v22 = vld [vmem:[%s2890_s5 + $0x18] sm:$0xff] (!%p506_p2)  ;;  %vm2685_vm2 = vmpackc.low (!%p506_p2), %vm781_vm1, %vm781_vm1  ;;  %v2092_v39 = vld [vmem:[%s2891_s6] ss:$0 sm:$0xff] (!%p506_p2)  ;;  %s2514_s20 = smov (!%p506_p2), 120   ;;  %s2515_s21 = smov (!%p506_p2), 112   ;;  %vm1621_vm4 = vcmask (!%p506_p2), 195584  }
   0xb   : > { %2326 = vmatpush3.bf16.msra.mxu1 (!%p506_p2), %v2323_v3  ;;  %v2335_v23 = vpack.c.bf16 (!%p506_p2), %v686_v22, %v685_v20  ;;  %s2519_s27 = smov (!%p506_p2), 8   ;;  %vm1872_vm5 = vcmask (!%p506_p2), 523264  }
   0xc   : > { %2328 = vmatprep.subr.bf16.mxu1 (!%p506_p2), %v2327_v5 }
   0xf   : > { %s2910_s25 = smov (!%p565_p3, %s2078_s25), 1  ;;  %2330 = vmatpush3.bf16.msra.mxu1 %v2327_v5 }
  0x10   : > { %s2635_s1 = sshll.u32 %s2910_s25, 4  ;;  %2332 = vmatprep.subr.bf16.mxu1 %v2331_v21  ;;  %s577_s30 = scalar_lea.vmem %s2887_s2, %s2910_s25 }
  0x11   : > { %s569_s23 = scalar_lea.vmem %s2905_s22, %s2635_s1  ;;  %s574_s29 = scalar_lea.vmem %s2906_s28, %s2635_s1  ;;  %v2699_v29 = vld [vmem:[%s577_s30] ss:$0 sm:$0xff] }
  0x12   : > { %v2645_v6 = vld [vmem:[%s569_s23] sm:$0xff]  ;;  %v2647_v7 = vld [vmem:[%s569_s23 + $0x8] sm:$0xff]  ;;  %s2516_s22 = smov 80   ;;  %s2517_s23 = smov 72  }
  0x13   : > { %v585_v8 = vld [vmem:[%s574_s29] sm:$0xff]  ;;  %v586_v9 = vld [vmem:[%s574_s29 + $0x8] sm:$0xff]  ;;  %s2520_s28 = smov 16  }
  0x14   : > { %v587_v10 = vadd.f32 %v585_v8, %v2645_v6  ;;  %v588_v11 = vadd.f32 %v586_v9, %v2647_v7 }
  0x16   : > { %2212 = vmatprep.mubr.msk.f32.mxu1 %vm601_vm0, %v587_v10 }
  0x17   : > { %2213 = vmatmul.mubr.msk.f32.vlgmr.msra.gmra.mrb[0].mxu1 %vm601_vm0, %v588_v11 }
  0x18   : > { %2223 = vmatprep.mubr.msk.f32.mxu1 %vm601_vm0, %v2645_v6  ;;  %2334 = vmatpush3.bf16.msra.mxu1 %v2331_v21 }
  0x19   : > { %2336 = vmatprep.subr.bf16.mxu1 %v2335_v23 }
  0x1c   : > { %2338 = vmatpush3.bf16.msra.mxu1 %v2335_v23 }
  0x1f   : > { %2224 = vmatmul.mubr.msk.f32.vlgmr.msra.gmra.mrb[2].mxu1 %vm601_vm0, %v2647_v7 }
  0xea   : > { %v2214_v13 = vpop.f32.mrb[0].mxu1 }
  0xeb   : > { %v2658_v14 = vadd.f32 %v2214_v13, %v2089_v12  ;;  %v674_v15 = vpop.f32.mrb[1].mxu1 }
  0xec   : > { %v2660_v16 = vadd.f32 %v2089_v12, %v674_v15 }
  0xee   : > { %2230 = vmatprep.mubr.msk.f32.mxu0 %vm781_vm1, %v2660_v16  ;;  %v2666_v17 = vpack.i.bf16 %v2658_v14, %v2660_v16 }
  0xf0   : > { %2430 = vrot.lane.b32.xlu0 %v2666_v17, %s2512_s26  ;;  %s2518_s26 = smov 104  }
  0xf2   : > { %v2225_v38 = vpop.f32.mrb[2].mxu1 }
  0xf3   : > { %v766_v40 = vpop.f32.mrb[3].mxu1  ;;  %v772_v41 = vadd.f32 %v2225_v38, %v2092_v39 }
  0xf4   : > { %v767_v42 = vadd.f32 %v2092_v39, %v766_v40 }
  0xf6   : > { %v2345_v43 = vpack.c.bf16 %v772_v41, %v767_v42  ;;  %v2733_v15 = vpack.i.bf16 %v772_v41, %v767_v42 }
  0xf8   : > { %2346 = vmatprep.subr.bf16.mxu1 %v2345_v43 }
  0xf9   : > { %2348 = vmatpush3.bf16.msra.mxu1 %v2345_v43 }
 0x162   : > { %v2431_v24 = vpop.permute.xlu0 %2430 }
 0x163   : > { %v2433_v25 = vunpack.i.h.bf16 %v2431_v24  ;;  %v2432_v26 = vunpack.i.l.bf16 %v2431_v24 }
 0x165   : > { %v2339_v28 = vpack.c.bf16 %v2433_v25, %v2432_v26 }
 0x167   : > { %2341 = vmatprep.subr.msk.bf16.mxu0 %vm2685_vm2, %v2339_v28 }
 0x168   : > { %2344 = vmatpush3.bf16.xpose.msk.msra.mxu0 %vm2685_vm2, %v2339_v28 }
 0x16f   : > { %2231 = vmatmul.mubr.msk.f32.vlgmr.msra.gmra.mrb[0].mxu0 %vm781_vm1, %v2658_v14 }
 0x242   : > { %v2232_v30 = vpop.f32.mrb[0].mxu0 }
 0x243   : > { %v866_v31 = vmul.f32 0.35355338, %v2232_v30  ;;  %v856_v32 = vpop.f32.mrb[1].mxu0 }
 0x244   : > { %v865_v33 = vmul.f32 0.35355338, %v856_v32 }
 0x245   : > { %v874_v34 = vadd.f32 %v2699_v29, %v866_v31 }
 0x246   : > { %v873_v35 = vadd.f32 %v2699_v29, %v865_v33 }
 0x247   : > { %v879_v36 = vsel %vm875_vm3, %v874_v34, -inf }
 0x248   : > { %880 = vmax.xlane.f32.xlu1 %v879_v36  ;;  %v876_v37 = vsel %vm875_vm3, %v873_v35, -inf }
 0x249   : > { %877 = vmax.xlane.f32.xlu0 %v876_v37 }
 0x259   : > { %2435 = vrot.lane.b32.xlu1 %v2666_v17, %s2513_s19 }
 0x25d   : > { %979 = vrot.lane.b32.xlu1 %v2660_v16, %s2514_s20 }
 0x2d5   : > { %v881_v44 = vpop.xlane.xlu1 %880 }
 0x2d6   : > { %v883_v45 = vsub.f32 %v874_v34, %v881_v44  ;;  %v878_v46 = vpop.xlane.xlu0 %877 }
 0x2d7   : > { %v882_v47 = vsub.f32 %v873_v35, %v878_v46 }
 0x2d8   : > { %v886_v48 = vmul.f32 1.442695, %v883_v45 }
 0x2d9   : > { %v884_v49 = vmul.f32 1.442695, %v882_v47  ;;  %v2436_v50 = vpop.permute.xlu1 %2435 }
 0x2da   : > { %2464 = vpow2.f32 %v886_v48  ;;  %v2438_v51 = vunpack.i.h.bf16 %v2436_v50  ;;  %v2437_v52 = vunpack.i.l.bf16 %v2436_v50 }
 0x2db   : > { %2466 = vpow2.f32 %v884_v49 }
 0x2dc   : > { %v2349_v53 = vpack.c.bf16 %v2438_v51, %v2437_v52 }
 0x2dd   : > { %v980_v58 = vpop.permute.xlu1 %979 }
 0x2de   : > { %2351 = vmatprep.subr.msk.bf16.mxu1 %vm2685_vm2, %v2349_v53 }
 0x2e4   : > { %v2465_v54 = vpop.eup %2464 }
 0x2e5   : > { %v891_v55 = vsel %vm875_vm3, %v2465_v54, 0.0  ;;  %v2467_v56 = vpop.eup %2466 }
 0x2e6   : > { %892 = vadd.xlane.f32.xlu1 %v891_v55  ;;  %v888_v57 = vsel %vm875_vm3, %v2467_v56, 0.0 }
 0x2ea   : > { %889 = vadd.xlane.f32.xlu1 %v888_v57 }
 0x2fb   : > { %981 = vrot.lane.b32.xlu1 %v2658_v14, %s2514_s20 }
 0x373   : > { %v893_v59 = vpop.xlane.xlu1 %892 }
 0x374   : > { %2468 = vrcp.f32 %v893_v59 }
 0x377   : > { %v890_v60 = vpop.xlane.xlu1 %889 }
 0x378   : > { %2470 = vrcp.f32 %v890_v60 }
 0x37b   : > { %v982_v1 = vpop.permute.xlu1 %981 }
 0x37e   : > { %v2469_v61 = vpop.eup %2468 }
 0x37f   : > { %v897_v0 = vmul.f32 %v2469_v61, %v2465_v54 }
 0x382   : > { %v2471_v62 = vpop.eup %2470 }
 0x383   : > { %v896_v63 = vmul.f32 %v2471_v62, %v2467_v56 }
 0x385   : > { %2237 = vmatprep.mubr.msk.f32.mxu1 %vm875_vm3, %v896_v63 }
 0x386   : > { %2238 = vmatmul.mubr.msk.f32.vlgmr.msra.gmra.mrb[4].mxu1 %vm875_vm3, %v897_v0 }
 0x387   : > { %2354 = vmatpush3.bf16.xpose.msk.msra.mxu1 %vm2685_vm2, %v2349_v53  ;;  %2244 = vmatprep.mubr.msk.f32.mxu1 %vm781_vm1, %v980_v58 }
 0x38e   : > { %2245 = vmatmul.mubr.msk.f32.vlgmr.msra.gmra.mrb[6].mxu1 %vm781_vm1, %v982_v1 }
 0x459   : > { %v2723_v2 = vpop.f32.mrb[4].mxu1 }
 0x45a   : > { %v2725_v3 = vpop.f32.mrb[5].mxu1 }
 0x461   : > { %v2246_v4 = vpop.f32.mrb[6].mxu1 }
 0x462   : > { %v1071_v5 = vmul.f32 0.35355338, %v2246_v4  ;;  %v1061_v8 = vpop.f32.mrb[7].mxu1 }
 0x463   : > { %v1070_v9 = vmul.f32 0.35355338, %v1061_v8 }
 0x464   : > { %v1073_v10 = vadd.f32 %v2699_v29, %v1071_v5 }
 0x465   : > { %v1072_v11 = vadd.f32 %v2699_v29, %v1070_v9 }
 0x466   : > { %v1077_v12 = vsel %vm875_vm3, %v1073_v10, -inf }
 0x467   : > { %1078 = vmax.xlane.f32.xlu1 %v1077_v12  ;;  %v1074_v13 = vsel %vm875_vm3, %v1072_v11, -inf }
 0x468   : > { %1075 = vmax.xlane.f32.xlu0 %v1074_v13 }
 0x478   : > { %1187 = vrot.lane.b32.xlu1 %v2658_v14, %s2515_s21 }
 0x47e   : > { %2440 = vrot.lane.b32.xlu0 %v2733_v15, %s2514_s20 }
 0x4f4   : > { %v1079_v18 = vpop.xlane.xlu1 %1078 }
 0x4f5   : > { %v1081_v19 = vsub.f32 %v1073_v10, %v1079_v18  ;;  %v1076_v20 = vpop.xlane.xlu0 %1075 }
 0x4f6   : > { %v1080_v21 = vsub.f32 %v1072_v11, %v1076_v20 }
 0x4f7   : > { %v1084_v22 = vmul.f32 1.442695, %v1081_v19 }
 0x4f8   : > { %v1082_v23 = vmul.f32 1.442695, %v1080_v21  ;;  %v1188_v45 = vpop.permute.xlu1 %1187 }
 0x4f9   : > { %2472 = vpow2.f32 %v1084_v22  ;;  %v2441_v24 = vpop.permute.xlu0 %2440 }
 0x4fa   : > { %v2443_v25 = vunpack.i.h.bf16 %v2441_v24  ;;  %v2442_v26 = vunpack.i.l.bf16 %v2441_v24  ;;  %2474 = vpow2.f32 %v1082_v23 }
 0x4fc   : > { %v2355_v28 = vpack.c.bf16 %v2443_v25, %v2442_v26 }
 0x4fe   : > { %2356 = vmatprep.subr.bf16.mxu0 %v2355_v28 }
 0x4ff   : > { %2358 = vmatpush3.bf16.msra.mxu0 %v2355_v28 }
 0x503   : > { %v2473_v30 = vpop.eup %2472 }
 0x504   : > { %v1089_v31 = vsel %vm875_vm3, %v2473_v30, 0.0  ;;  %v2475_v32 = vpop.eup %2474 }
 0x505   : > { %1090 = vadd.xlane.f32.xlu0 %v1089_v31  ;;  %v1086_v33 = vsel %vm875_vm3, %v2475_v32, 0.0 }
 0x509   : > { %1087 = vadd.xlane.f32.xlu0 %v1086_v33 }
 0x51f   : > { %2445 = vrot.lane.b32.xlu0 %v2666_v17, %s2516_s22  ;;  %s2521_s22 = smov 24  }
 0x523   : > { %1185 = vrot.lane.b32.xlu0 %v2660_v16, %s2515_s21 }
 0x592   : > { %v1091_v34 = vpop.xlane.xlu0 %1090 }
 0x593   : > { %2476 = vrcp.f32 %v1091_v34 }
 0x596   : > { %v1088_v35 = vpop.xlane.xlu0 %1087 }
 0x597   : > { %2478 = vrcp.f32 %v1088_v35 }
 0x59a   : > { %v2446_v36 = vpop.permute.xlu0 %2445 }
 0x59b   : > { %v2448_v37 = vunpack.i.h.bf16 %v2446_v36  ;;  %v2447_v38 = vunpack.i.l.bf16 %v2446_v36 }
 0x59d   : > { %v2359_v39 = vpack.c.bf16 %v2448_v37, %v2447_v38  ;;  %v2477_v40 = vpop.eup %2476 }
 0x59e   : > { %v1095_v43 = vmul.f32 %v2477_v40, %v2473_v30  ;;  %v1186_v44 = vpop.permute.xlu0 %1185 }
 0x59f   : > { %2361 = vmatprep.subr.msk.bf16.mxu0 %vm2685_vm2, %v2359_v39 }
 0x5a1   : > { %v2479_v41 = vpop.eup %2478 }
 0x5a2   : > { %v1094_v42 = vmul.f32 %v2479_v41, %v2475_v32 }
 0x5a4   : > { %2251 = vmatprep.mubr.msk.f32.mxu0 %vm875_vm3, %v1094_v42 }
 0x5a5   : > { %2252 = vmatmul.mubr.msk.f32.vlgmr.msra.gmra.mrb[2].mxu0 %vm875_vm3, %v1095_v43 }
 0x5a6   : > { %2364 = vmatpush3.bf16.xpose.msk.msra.mxu0 %vm2685_vm2, %v2359_v39  ;;  %2258 = vmatprep.mubr.msk.f32.mxu0 %vm781_vm1, %v1186_v44 }
 0x5ad   : > { %2259 = vmatmul.mubr.msk.f32.vlgmr.msra.gmra.mrb[4].mxu0 %vm781_vm1, %v1188_v45 }
 0x678   : > { %v2750_v46 = vpop.f32.mrb[2].mxu0 }
 0x679   : > { %v2752_v47 = vpop.f32.mrb[3].mxu0 }
 0x680   : > { %v2260_v48 = vpop.f32.mrb[4].mxu0 }
 0x681   : > { %v1277_v49 = vmul.f32 0.35355338, %v2260_v48  ;;  %v1267_v50 = vpop.f32.mrb[5].mxu0 }
 0x682   : > { %v1276_v51 = vmul.f32 0.35355338, %v1267_v50 }
 0x683   : > { %v1279_v52 = vadd.f32 %v2699_v29, %v1277_v49 }
 0x684   : > { %v1278_v53 = vadd.f32 %v2699_v29, %v1276_v51 }
 0x685   : > { %v1283_v54 = vsel %vm875_vm3, %v1279_v52, -inf }
 0x686   : > { %1284 = vmax.xlane.f32.xlu1 %v1283_v54  ;;  %v1280_v55 = vsel %vm875_vm3, %v1278_v53, -inf  ;;  %v1626_v54 = vld [vmem:[%s2892_s7 + $0x10] sm:$0xff] }
 0x687   : > { %1281 = vmax.xlane.f32.xlu0 %v1280_v55 }
 0x697   : > { %2455 = vrot.lane.b32.xlu1 %v2666_v17, %s2517_s23 }
 0x69d   : > { %2450 = vrot.lane.b32.xlu0 %v2733_v15, %s2515_s21 }
 0x713   : > { %v1285_v56 = vpop.xlane.xlu1 %1284 }
 0x714   : > { %v1287_v57 = vsub.f32 %v1279_v52, %v1285_v56  ;;  %v1282_v58 = vpop.xlane.xlu0 %1281  ;;  %v1627_v56 = vld [vmem:[%s2892_s7 + $0x18] sm:$0xff] }
 0x715   : > { %v1286_v59 = vsub.f32 %v1278_v53, %v1282_v58  ;;  %v1625_v53 = vld [vmem:[%s2892_s7 + $0x8] sm:$0xff] }
 0x716   : > { %v1290_v60 = vmul.f32 1.442695, %v1287_v57  ;;  %v2383_v57 = vpack.c.bf16 %v1627_v56, %v1626_v54 }
 0x717   : > { %v1288_v61 = vmul.f32 1.442695, %v1286_v59  ;;  %v2456_v62 = vpop.permute.xlu1 %2455 }
 0x718   : > { %2480 = vpow2.f32 %v1290_v60  ;;  %v2451_v63 = vpop.permute.xlu0 %2450  ;;  %v2458_v0 = vunpack.i.h.bf16 %v2456_v62  ;;  %v2457_v1 = vunpack.i.l.bf16 %v2456_v62 }
 0x719   : > { %v2453_v4 = vunpack.i.h.bf16 %v2451_v63  ;;  %v2452_v5 = vunpack.i.l.bf16 %v2451_v63  ;;  %2482 = vpow2.f32 %v1288_v61 }
 0x71a   : > { %v2369_v9 = vpack.c.bf16 %v2458_v0, %v2457_v1 }
 0x71b   : > { %v2365_v8 = vpack.c.bf16 %v2453_v4, %v2452_v5 }
 0x71d   : > { %2366 = vmatprep.subr.bf16.mxu1 %v2365_v8 }
 0x71e   : > { %2368 = vmatpush3.bf16.msra.mxu1 %v2365_v8 }
 0x71f   : > { %2371 = vmatprep.subr.msk.bf16.mxu1 %vm2685_vm2, %v2369_v9 }
 0x722   : > { %v2481_v17 = vpop.eup %2480 }
 0x723   : > { %v1295_v10 = vsel %vm875_vm3, %v2481_v17, 0.0  ;;  %v2483_v11 = vpop.eup %2482 }
 0x724   : > { %1296 = vadd.xlane.f32.xlu0 %v1295_v10  ;;  %v1292_v12 = vsel %vm875_vm3, %v2483_v11, 0.0 }
 0x728   : > { %1293 = vadd.xlane.f32.xlu0 %v1292_v12 }
 0x73e   : > { %1389 = vrot.lane.b32.xlu0 %v2660_v16, %s2518_s26 }
 0x742   : > { %1391 = vrot.lane.b32.xlu0 %v2658_v14, %s2518_s26 }
 0x7b1   : > { %v1297_v13 = vpop.xlane.xlu0 %1296 }
 0x7b2   : > { %2484 = vrcp.f32 %v1297_v13 }
 0x7b5   : > { %v1294_v18 = vpop.xlane.xlu0 %1293 }
 0x7b6   : > { %2486 = vrcp.f32 %v1294_v18 }
 0x7b9   : > { %v1390_v23 = vpop.permute.xlu0 %1389 }
 0x7bc   : > { %v2485_v19 = vpop.eup %2484 }
 0x7bd   : > { %v1301_v22 = vmul.f32 %v2485_v19, %v2481_v17  ;;  %v1392_v16 = vpop.permute.xlu0 %1391 }
 0x7c0   : > { %v2487_v20 = vpop.eup %2486 }
 0x7c1   : > { %v1300_v21 = vmul.f32 %v2487_v20, %v2483_v11  ;;  %v2120_v11 = vld [vmem:[%s2893_s8] ss:$0 sm:$0xff] }
 0x7c3   : > { %2265 = vmatprep.mubr.msk.f32.mxu1 %vm875_vm3, %v1300_v21 }
 0x7c4   : > { %2266 = vmatmul.mubr.msk.f32.vlgmr.msra.gmra.mrb[8].mxu1 %vm875_vm3, %v1301_v22 }
 0x7c5   : > { %2374 = vmatpush3.bf16.xpose.msk.msra.mxu1 %vm2685_vm2, %v2369_v9  ;;  %2272 = vmatprep.mubr.msk.f32.mxu1 %vm781_vm1, %v1390_v23 }
 0x7cc   : > { %2273 = vmatmul.mubr.msk.f32.vlgmr.msra.gmra.mrb[10].mxu1 %vm781_vm1, %v1392_v16 }
 0x897   : > { %v2267_v14 = vpop.f32.mrb[8].mxu1 }
 0x898   : > { %v1380_v24 = vpop.f32.mrb[9].mxu1 }
 0x89f   : > { %v2274_v25 = vpop.f32.mrb[10].mxu1 }
 0x8a0   : > { %v1481_v26 = vmul.f32 0.35355338, %v2274_v25  ;;  %v1471_v28 = vpop.f32.mrb[11].mxu1 }
 0x8a1   : > { %v1480_v30 = vmul.f32 0.35355338, %v1471_v28 }
 0x8a2   : > { %v1483_v31 = vadd.f32 %v2699_v29, %v1481_v26 }
 0x8a3   : > { %v1482_v32 = vadd.f32 %v2699_v29, %v1480_v30 }
 0x8a4   : > { %v1487_v33 = vsel %vm875_vm3, %v1483_v31, -inf }
 0x8a5   : > { %1488 = vmax.xlane.f32.xlu0 %v1487_v33  ;;  %v1484_v27 = vsel %vm875_vm3, %v1482_v32, -inf  ;;  %v1765_v33 = vld [vmem:[%s2896_s11 + $0x10] sm:$0xff] }
 0x8a6   : > { %1485 = vmax.xlane.f32.xlu1 %v1484_v27  ;;  %v1766_v27 = vld [vmem:[%s2896_s11 + $0x18] sm:$0xff] }
 0x932   : > { %v1489_v34 = vpop.xlane.xlu0 %1488 }
 0x933   : > { %v1491_v35 = vsub.f32 %v1483_v31, %v1489_v34  ;;  %v1486_v36 = vpop.xlane.xlu1 %1485  ;;  %v1764_v31 = vld [vmem:[%s2896_s11 + $0x8] sm:$0xff]  ;;  %v2391_v34 = vpack.c.bf16 %v1766_v27, %v1765_v33  ;;  %v2131_v33 = vld [vmem:[%s2900_s15] ss:$0 sm:$0xff] }
 0x934   : > { %v1490_v37 = vsub.f32 %v1482_v32, %v1486_v36  ;;  %v1858_v36 = vld [vmem:[%s2898_s13 + $0x8] sm:$0xff] }
 0x935   : > { %v1494_v38 = vmul.f32 1.442695, %v1491_v35  ;;  %v1857_v35 = vld [vmem:[%s2898_s13] sm:$0xff] }
 0x936   : > { %v1492_v39 = vmul.f32 1.442695, %v1490_v37  ;;  %v1859_v37 = vld [vmem:[%s2898_s13 + $0x10] sm:$0xff] }
 0x937   : > { %2488 = vpow2.f32 %v1494_v38  ;;  %v2395_v38 = vpack.c.bf16 %v1858_v36, %v1857_v35  ;;  %v2132_v35 = vld [vmem:[%s2901_s16] ss:$0 sm:$0xff] }
 0x938   : > { %2490 = vpow2.f32 %v1492_v39  ;;  %v1860_v39 = vld [vmem:[%s2898_s13 + $0x18] sm:$0xff] }
 0x941   : > { %v2489_v40 = vpop.eup %2488 }
 0x942   : > { %v2491_v41 = vpop.eup %2490  ;;  %v1499_v42 = vsel %vm875_vm3, %v2489_v40, 0.0 }
 0x943   : > { %1500 = vadd.xlane.f32.xlu1 %v1499_v42  ;;  %v1496_v29 = vsel %vm875_vm3, %v2491_v41, 0.0  ;;  %v1862_v42 = vld [vmem:[%s2898_s13 + $0x28] sm:$0xff] }
 0x944   : > { %1497 = vadd.xlane.f32.xlu0 %v1496_v29 }
 0x954   : > { %1595 = vrot.lane.b32.xlu1 %v2752_v47, %s2519_s27 }
 0x958   : > { %1597 = vrot.lane.b32.xlu1 %v2750_v46, %s2519_s27 }
 0x95a   : > { %2460 = vrot.lane.b32.xlu0 %v2733_v15, %s2518_s26  ;;  %v1624_v15 = vld [vmem:[%s2892_s7] sm:$0xff]  ;;  %s582_s26 = scalar_lea.vmem %s2902_s17, %s2635_s1 }
 0x95b   : > { %v2379_v55 = vpack.c.bf16 %v1625_v53, %v1624_v15 }
 0x95c   : > { %1605 = vrot.lane.b32.xlu1 %v2267_v14, %s2520_s28 }
 0x95e   : > { %1603 = vrot.lane.b32.xlu0 %v1380_v24, %s2520_s28 }
 0x9d0   : > { %v1501_v43 = vpop.xlane.xlu1 %1500 }
 0x9d1   : > { %2492 = vrcp.f32 %v1501_v43  ;;  %v1498_v44 = vpop.xlane.xlu0 %1497 }
 0x9d2   : > { %2494 = vrcp.f32 %v1498_v44 }
 0x9d4   : > { %v1596_v60 = vpop.permute.xlu1 %1595 }
 0x9d5   : > { %v2461_v45 = vpop.permute.xlu0 %2460  ;;  %v1617_v0 = vsel %vm781_vm1, %v2725_v3, %v1596_v60 }
 0x9d6   : > { %v2463_v48 = vunpack.i.h.bf16 %v2461_v45  ;;  %v2462_v49 = vunpack.i.l.bf16 %v2461_v45 }
 0x9d8   : > { %v2375_v50 = vpack.c.bf16 %v2463_v48, %v2462_v49  ;;  %v1598_v61 = vpop.permute.xlu1 %1597 }
 0x9d9   : > { %v1604_v63 = vpop.permute.xlu0 %1603  ;;  %v1618_v4 = vsel %vm781_vm1, %v2723_v2, %v1598_v61  ;;  %v2125_v61 = vld [vmem:[%s2897_s12] ss:$0 sm:$0xff] }
 0x9da   : > { %2376 = vmatprep.subr.bf16.mxu0 %v2375_v50  ;;  %v1619_v5 = vsel %vm875_vm3, %v1617_v0, %v1604_v63 }
 0x9db   : > { %v2493_v51 = vpop.eup %2492  ;;  %2378 = vmatpush3.bf16.msra.mxu0 %v2375_v50 }
 0x9dc   : > { %v2495_v47 = vpop.eup %2494  ;;  %v1505_v46 = vmul.f32 %v2493_v51, %v2489_v40  ;;  %2380 = vmatprep.subr.bf16.mxu0 %v2379_v55  ;;  %v1606_v62 = vpop.permute.xlu1 %1605  ;;  %v2399_v40 = vpack.c.bf16 %v1860_v39, %v1859_v37 }
 0x9dd   : > { %v1504_v52 = vmul.f32 %v2495_v47, %v2491_v41  ;;  %v1620_v9 = vsel %vm875_vm3, %v1618_v4, %v1606_v62  ;;  %v1861_v41 = vld [vmem:[%s2898_s13 + $0x20] sm:$0xff] }
 0x9de   : > { %v2403_v29 = vpack.c.bf16 %v1862_v42, %v1861_v41  ;;  %v2123_v47 = vld [vmem:[%s2894_s9] ss:$0 sm:$0xff] }
 0x9df   : > { %2279 = vmatprep.mubr.msk.f32.mxu0 %vm875_vm3, %v1504_v52 }
 0x9e0   : > { %2280 = vmatmul.mubr.msk.f32.vlgmr.msra.gmra.mrb[6].mxu0 %vm875_vm3, %v1505_v46  ;;  %v2124_v46 = vld [vmem:[%s2895_s10] ss:$0 sm:$0xff] }
 0x9e1   : > { %2382 = vmatpush3.bf16.msra.mxu0 %v2379_v55 }
 0x9e2   : > { %2384 = vmatprep.subr.bf16.mxu0 %v2383_v57 }
 0x9e5   : > { %2386 = vmatpush3.bf16.msra.mxu0 %v2383_v57 }
 0x9e6   : > { %2396 = vmatprep.subr.bf16.mxu0 %v2395_v38 }
 0xab3   : > { %v2281_v58 = vpop.f32.mrb[6].mxu0 }
 0xab4   : > { %1613 = vrot.lane.b32.xlu1 %v2281_v58, %s2521_s22  ;;  %v1584_v59 = vpop.f32.mrb[7].mxu0  ;;  %v1863_v58 = vld [vmem:[%s2898_s13 + $0x30] sm:$0xff] }
 0xab5   : > { %1611 = vrot.lane.b32.xlu0 %v1584_v59, %s2521_s22  ;;  %v1864_v59 = vld [vmem:[%s2898_s13 + $0x38] sm:$0xff] }
 0xab6   : > { %v2407_v60 = vpack.c.bf16 %v1864_v59, %v1863_v58 }
 0xb26   : > { %v1614_v1 = vpop.permute.xlu1 %1613 }
 0xb27   : > { %v1612_v8 = vpop.permute.xlu0 %1611  ;;  %v1623_v10 = vsel %vm1621_vm4, %v1620_v9, %v1614_v1 }
 0xb28   : > { %v1622_v17 = vsel %vm1621_vm4, %v1619_v5, %v1612_v8  ;;  %v2128_v8 = vld [vmem:[%s2899_s14] ss:$0 sm:$0xff] }
 0xb29   : > { %2290 = vmatprep.mubr.msk.f32.mxu0 %vm601_vm0, %v1622_v17 }
 0xb2a   : > { %2291 = vmatmul.mubr.msk.f32.vlgmr.msra.gmra.mrb[8].mxu0 %vm601_vm0, %v1623_v10 }
 0xb2b   : > { %2398 = vmatpush3.bf16.msra.mxu0 %v2395_v38 }
 0xb2c   : > { %2400 = vmatprep.subr.bf16.mxu0 %v2399_v40 }
 0xb2f   : > { %2402 = vmatpush3.bf16.msra.mxu0 %v2399_v40 }
 0xb30   : > { %2404 = vmatprep.subr.bf16.mxu0 %v2403_v29 }
 0xb33   : > { %2406 = vmatpush3.bf16.msra.mxu0 %v2403_v29 }
 0xb34   : > { %2408 = vmatprep.subr.bf16.mxu0 %v2407_v60 }
 0xb37   : > { %2410 = vmatpush3.bf16.msra.mxu0 %v2407_v60 }
 0xbfd   : > { %v2292_v3 = vpop.f32.mrb[8].mxu0 }
 0xbfe   : > { %v1713_v12 = vadd.f32 %v2292_v3, %v2120_v11  ;;  %v1707_v13 = vpop.f32.mrb[9].mxu0 }
 0xbff   : > { %v1708_v18 = vadd.f32 %v2120_v11, %v1707_v13 }
 0xc00   : > { %v1717_v2 = vadd.f32 %v1713_v12, %v2647_v7 }
 0xc01   : > { %v1716_v19 = vadd.f32 %v1708_v18, %v2645_v6  ;;  %v1763_v6 = vld [vmem:[%s2896_s11] sm:$0xff] }
 0xc02   : > { %v1723_v20 = vsel %vm601_vm0, %v1717_v2, 0.0  ;;  %v2387_v32 = vpack.c.bf16 %v1764_v31, %v1763_v6 }
 0xc03   : > { %1724 = vadd.xlane.f32.xlu1 %v1723_v20  ;;  %v1720_v21 = vsel %vm601_vm0, %v1716_v19, 0.0 }
 0xc04   : > { %1721 = vadd.xlane.f32.xlu0 %v1720_v21  ;;  %2388 = vmatprep.subr.bf16.mxu1 %v2387_v32 }
 0xc05   : > { %2390 = vmatpush3.bf16.msra.mxu1 %v2387_v32 }
 0xc06   : > { %2392 = vmatprep.subr.bf16.mxu1 %v2391_v34 }
 0xc09   : > { %2394 = vmatpush3.bf16.msra.mxu1 %v2391_v34 }
 0xc90   : > { %v1725_v22 = vpop.xlane.xlu1 %1724 }
 0xc91   : > { %v1728_v23 = vmul.f32 0.03125, %v1725_v22  ;;  %v1722_v16 = vpop.xlane.xlu0 %1721 }
 0xc92   : > { %v1727_v14 = vmul.f32 0.03125, %v1722_v16 }
 0xc93   : > { %v1730_v24 = vsub.f32 %v1717_v2, %v1728_v23 }
 0xc94   : > { %v1729_v25 = vsub.f32 %v1716_v19, %v1727_v14 }
 0xc95   : > { %v1732_v30 = vmul.f32 %v1730_v24, %v1730_v24 }
 0xc96   : > { %v1731_v26 = vmul.f32 %v1729_v25, %v1729_v25 }
 0xc97   : > { %v1736_v7 = vsel %vm601_vm0, %v1732_v30, 0.0 }
 0xc98   : > { %v1733_v28 = vsel %vm601_vm0, %v1731_v26, 0.0 }
 0xc99   : > { %1734 = vadd.xlane.f32.xlu0 %v1733_v28 }
 0xc9d   : > { %1737 = vadd.xlane.f32.xlu0 %v1736_v7 }
 0xd26   : > { %v1735_v43 = vpop.xlane.xlu0 %1734 }
 0xd27   : > { %v1739_v44 = vmul.f32 0.03125, %v1735_v43 }
 0xd29   : > { %v1741_v45 = vadd.f32 1e-05, %v1739_v44 }
 0xd2a   : > { %v1738_v48 = vpop.xlane.xlu0 %1737 }
 0xd2b   : > { %2496 = vrsqrt.f32 %v1741_v45  ;;  %v1740_v49 = vmul.f32 0.03125, %v1738_v48 }
 0xd2d   : > { %v1742_v50 = vadd.f32 1e-05, %v1740_v49 }
 0xd2f   : > { %2498 = vrsqrt.f32 %v1742_v50 }
 0xd35   : > { %v2497_v51 = vpop.eup %2496 }
 0xd36   : > { %v1745_v52 = vmul.f32 %v2497_v51, %v1729_v25 }
 0xd38   : > { %v1753_v15 = vmul.f32 %v2123_v47, %v1745_v52 }
 0xd39   : > { %v2499_v53 = vpop.eup %2498 }
 0xd3a   : > { %v1746_v54 = vmul.f32 %v2499_v53, %v1730_v24  ;;  %v1761_v55 = vadd.f32 %v2124_v46, %v1753_v15 }
 0xd3c   : > { %v1754_v56 = vmul.f32 %v2123_v47, %v1746_v54  ;;  %2301 = vmatprep.mubr.msk.f32.mxu1 %vm601_vm0, %v1761_v55 }
 0xd3e   : > { %v1762_v57 = vadd.f32 %v2124_v46, %v1754_v56 }
 0xd40   : > { %2302 = vmatmul.mubr.msk.f32.vlgmr.msra.gmra.mrb[12].mxu1 %vm601_vm0, %v1762_v57 }
 0xe13   : > { %v2303_v62 = vpop.f32.mrb[12].mxu1 }
 0xe14   : > { %v1852_v63 = vadd.f32 %v2303_v62, %v2125_v61  ;;  %v1846_v0 = vpop.f32.mrb[13].mxu1 }
 0xe15   : > { %v1847_v1 = vadd.f32 %v2125_v61, %v1846_v0 }
 0xe16   : > { %v1856_v5 = vmax.f32 %v1852_v63, 0.0 }
 0xe17   : > { %v1855_v4 = vmax.f32 %v1847_v1, 0.0 }
 0xe19   : > { %2320 = vmatprep.mubr.msk.f32.mxu0 %vm1872_vm5, %v1855_v4 }
 0xe1a   : > { %2321 = vmatmul.mubr.msk.f32.vlgmr.msra.gmra.mrb[10].mxu0 %vm1872_vm5, %v1856_v5 }
 0xeed   : > { %v2322_v9 = vpop.f32.mrb[10].mxu0 }
 0xeee   : > { %v1951_v17 = vadd.f32 %v2322_v9, %v2128_v8  ;;  %v1945_v10 = vpop.f32.mrb[11].mxu0 }
 0xeef   : > { %v1946_v11 = vadd.f32 %v2128_v8, %v1945_v10 }
 0xef0   : > { %v1955_v3 = vadd.f32 %v1951_v17, %v1762_v57 }
 0xef1   : > { %v1954_v12 = vadd.f32 %v1946_v11, %v1761_v55 }
 0xef2   : > { %v1961_v13 = vsel %vm601_vm0, %v1955_v3, 0.0 }
 0xef3   : > { %1962 = vadd.xlane.f32.xlu0 %v1961_v13  ;;  %v1958_v18 = vsel %vm601_vm0, %v1954_v12, 0.0 }
 0xef4   : > { %1959 = vadd.xlane.f32.xlu1 %v1958_v18 }
 0xf80   : > { %v1963_v2 = vpop.xlane.xlu0 %1962 }
 0xf81   : > { %v1965_v19 = vmul.f32 0.03125, %v1963_v2  ;;  %v1960_v20 = vpop.xlane.xlu1 %1959 }
 0xf82   : > { %v1964_v21 = vmul.f32 0.03125, %v1960_v20 }
 0xf83   : > { %v1967_v22 = vsub.f32 %v1955_v3, %v1965_v19 }
 0xf84   : > { %v1966_v23 = vsub.f32 %v1954_v12, %v1964_v21 }
 0xf85   : > { %v1969_v16 = vmul.f32 %v1967_v22, %v1967_v22 }
 0xf86   : > { %v1968_v14 = vmul.f32 %v1966_v23, %v1966_v23 }
 0xf87   : > { %v1973_v24 = vsel %vm601_vm0, %v1969_v16, 0.0 }
 0xf88   : > { %1974 = vadd.xlane.f32.xlu0 %v1973_v24  ;;  %v1970_v25 = vsel %vm601_vm0, %v1968_v14, 0.0 }
 0xf89   : > { %1971 = vadd.xlane.f32.xlu1 %v1970_v25 }
0x1015   : > { %v1975_v26 = vpop.xlane.xlu0 %1974 }
0x1016   : > { %v1977_v28 = vmul.f32 0.03125, %v1975_v26  ;;  %v1972_v30 = vpop.xlane.xlu1 %1971 }
0x1017   : > { %v1976_v7 = vmul.f32 0.03125, %v1972_v30 }
0x1018   : > { %v1979_v6 = vadd.f32 1e-05, %v1977_v28 }
0x1019   : > { %v1978_v31 = vadd.f32 1e-05, %v1976_v7 }
0x101a   : > { %2500 = vrsqrt.f32 %v1979_v6 }
0x101b   : > { %2502 = vrsqrt.f32 %v1978_v31 }
0x1024   : > { %v2501_v32 = vpop.eup %2500 }
0x1025   : > { %v2503_v27 = vpop.eup %2502  ;;  %v1983_v34 = vmul.f32 %v2501_v32, %v1967_v22 }
0x1026   : > { %v1982_v36 = vmul.f32 %v2503_v27, %v1966_v23 }
0x1027   : > { %v1991_v37 = vmul.f32 %v2131_v33, %v1983_v34 }
0x1028   : > { %v1990_v38 = vmul.f32 %v2131_v33, %v1982_v36 }
0x1029   : > { %v1999_v39 = vadd.f32 %v2132_v35, %v1991_v37 }
0x102a   : > { %v1998_v40 = vadd.f32 %v2132_v35, %v1990_v38 }
0x102b   : > { %2001 = vst.msk [vmem:[%s582_s26 + $0x8] sm:$0xff] %vm601_vm0, %v1999_v39 }
0x102c   : > { %2000 = vst.msk [vmem:[%s582_s26] sm:$0xff] %vm601_vm0, %v1998_v40 }
0x102d PF: > { %s27_s24 = sadd.s32 1, %s2510_s24  }
0x102e   : > { %p24_p4 = scmp.ge.s32.totalorder %s27_s24, 4  }
0x1030   :  { %26 = sbr.rel (!%p24_p4) target bundleno = 3 (0x3), region = 124 }

</bundles_post_ra>
